<compile_context>
chip_gen: v7x
topology: tpu7x:2x2x1
jax: 0.10.0
libtpu: 0.0.40
codegen_flags: <defaults>
</compile_context>

<pallas_src>
import functools

import jax
import jax.numpy as jnp
from jax import lax
from jax.experimental import pallas as pl
from jax.experimental.pallas import tpu as pltpu


def _attention_kernel(x_ref, g_ref, b_ref, wqkv_ref, wo_ref, bo_ref, o_ref,
                      acc_ref, *, heads, dpad, eps, mxu_dtype, approx_recip):
    x = x_ref[0].astype(jnp.float32)                      # (N, H)

    # ---- LayerNorm over last dim (f32 VPU/EUP math; v5e-safe) ----
    mean = jnp.mean(x, axis=-1, keepdims=True)
    cent = x - mean
    var = jnp.mean(cent * cent, axis=-1, keepdims=True)
    xn = cent * lax.rsqrt(var + eps)
    xn = (xn * g_ref[0] + b_ref[0]).astype(mxu_dtype)     # (N, H), MXU operand

    acc_ref[...] = jnp.zeros_like(acc_ref)                # f32 (N, H) accumulator

    def head_body(h, carry):
        # Per-head weight slab via dynamic *leading*-dim index (no lane ds).
        w_h = wqkv_ref[h]                                 # (H, 3*dpad)
        qkv_h = jnp.dot(xn, w_h,
                        preferred_element_type=jnp.float32)  # (N, 3*dpad), K = H
        qkv_h = qkv_h.astype(mxu_dtype)
        # 128-lane-aligned static splits (dpad is a multiple of 128).
        qh = qkv_h[:, 0:dpad]                             # pre-scaled (scale in Wq)
        kh = qkv_h[:, dpad:2 * dpad]
        vh = qkv_h[:, 2 * dpad:3 * dpad]
        # q k^T by contracting the last dims of both operands (no explicit .T).
        dots = lax.dot_general(qh, kh, (((1,), (1,)), ((), ())),
                               preferred_element_type=jnp.float32)   # (N, N)
        m = jnp.max(dots, axis=-1, keepdims=True)
        p = jnp.exp(dots - m)                             # f32 unnormalized probs
        denom = jnp.sum(p, axis=-1, keepdims=True)
        pv = jnp.dot(p.astype(mxu_dtype), vh,
                     preferred_element_type=jnp.float32)  # (N, dpad)
        # Softmax normalization folded into the small PV result (EUP recip).
        outh = (pv * pl.reciprocal(denom, approx=approx_recip)).astype(mxu_dtype)
        # Per-head slice of the output projection, accumulated in f32.
        acc_ref[...] += jnp.dot(outh, wo_ref[h],
                                preferred_element_type=jnp.float32)  # (N, H)
        return carry

    lax.fori_loop(0, heads, head_body, 0)

    o_ref[0] = (acc_ref[...] + bo_ref[0]).astype(o_ref.dtype)


def _pick_vmem_limit_bytes():
    # ~75% of physical VMEM, capped at 100 MiB:
    #   v5e/v6e (128 MiB) -> ~96 MiB, v7x (64 MiB) -> ~48 MiB.
    try:
        cap = int(pltpu.get_tpu_info().vmem_capacity_bytes)
        return min(cap * 3 // 4, 100 * 1024 * 1024)
    except Exception:
        return 32 * 1024 * 1024   # conservative fallback


def attention_pallas(x, params, *, heads, dim_head, eps=1e-5,
                     mxu_dtype=jnp.bfloat16, approx_softmax_recip=True):
    """x: (B, N, H) float32.  params: dict of LN/linear weights (see init)."""
    B, N, H = x.shape
    assert H == heads * dim_head
    scale = dim_head ** (-0.5)
    dpad = ((dim_head + 127) // 128) * 128   # lane-aligned per-head width

    gamma = params["ln_gamma"].reshape(1, H).astype(jnp.float32)
    beta = params["ln_beta"].reshape(1, H).astype(jnp.float32)

    def per_head_cols(w_t):   # (H, H) -> (heads, H, dpad), zero lane padding
        w3 = w_t.reshape(H, heads, dim_head).transpose(1, 0, 2)
        return jnp.pad(w3, ((0, 0), (0, 0), (0, dpad - dim_head)))

    # nn.Linear computes y = x @ W^T. Fold the softmax scale into Wq and pack
    # each head's [q | k | v] columns (lane-padded to dpad) contiguously.
    wqkv = jnp.concatenate([per_head_cols(params["wq"].T * scale),
                            per_head_cols(params["wk"].T),
                            per_head_cols(params["wv"].T)],
                           axis=-1).astype(mxu_dtype)          # (heads, H, 3*dpad)
    wo = jnp.pad(params["wo"].T.reshape(heads, dim_head, H),
                 ((0, 0), (0, dpad - dim_head), (0, 0))
                 ).astype(mxu_dtype)                           # (heads, dpad, H)
    bo = params["bo"].reshape(1, H).astype(jnp.float32)

    kernel = functools.partial(
        _attention_kernel, heads=heads, dpad=dpad, eps=eps,
        mxu_dtype=mxu_dtype, approx_recip=approx_softmax_recip)

    row = pl.BlockSpec((1, H), lambda b: (0, 0))

    return pl.pallas_call(
        kernel,
        out_shape=jax.ShapeDtypeStruct((B, N, H), x.dtype),
        grid_spec=pltpu.PrefetchScalarGridSpec(
            num_scalar_prefetch=0,
            grid=(B,),
            in_specs=[
                pl.BlockSpec((1, N, H), lambda b: (b, 0, 0)),             # x
                row,                                                      # gamma
                row,                                                      # beta
                pl.BlockSpec((heads, H, 3 * dpad), lambda b: (0, 0, 0)),  # per-head [Wq*s|Wk|Wv]
                pl.BlockSpec((heads, dpad, H), lambda b: (0, 0, 0)),      # per-head Wo^T
                row,                                                      # bo
            ],
            out_specs=pl.BlockSpec((1, N, H), lambda b: (b, 0, 0)),
            scratch_shapes=[pltpu.VMEM((N, H), jnp.float32)],             # output accumulator
        ),
        compiler_params=pltpu.CompilerParams(
            dimension_semantics=("parallel",),   # B >= 2 -> both v7x TCs busy
            vmem_limit_bytes=_pick_vmem_limit_bytes()),
    )(x, gamma, beta, wqkv, wo, bo)


def attention_ref(x, params, *, heads, dim_head, eps=1e-5):
    """Pure-JAX reference mirroring the PyTorch forward (dropout=0)."""
    B, N, H = x.shape
    scale = dim_head ** (-0.5)
    mean = jnp.mean(x, axis=-1, keepdims=True)
    var = jnp.mean((x - mean) ** 2, axis=-1, keepdims=True)
    xn = (x - mean) / jnp.sqrt(var + eps) * params["ln_gamma"] + params["ln_beta"]
    q = xn @ params["wq"].T
    k = xn @ params["wk"].T
    v = xn @ params["wv"].T

    def split(t):  # b n (h d) -> b h n d
        return t.reshape(B, N, heads, dim_head).transpose(0, 2, 1, 3)

    q, k, v = split(q), split(k), split(v)
    dots = jnp.einsum("bhnd,bhmd->bhnm", q, k) * scale
    attn = jax.nn.softmax(dots, axis=-1)
    out = jnp.einsum("bhnm,bhmd->bhnd", attn, v)
    out = out.transpose(0, 2, 1, 3).reshape(B, N, H)
    return out @ params["wo"].T + params["bo"]


def init_params(key, hidden_dim):
    ks = jax.random.split(key, 5)
    s = 1.0 / jnp.sqrt(hidden_dim)
    return {
        "ln_gamma": jnp.ones((hidden_dim,), jnp.float32),
        "ln_beta": jnp.zeros((hidden_dim,), jnp.float32),
        "wq": jax.random.uniform(ks[0], (hidden_dim, hidden_dim), jnp.float32, -s, s),
        "wk": jax.random.uniform(ks[1], (hidden_dim, hidden_dim), jnp.float32, -s, s),
        "wv": jax.random.uniform(ks[2], (hidden_dim, hidden_dim), jnp.float32, -s, s),
        "wo": jax.random.uniform(ks[3], (hidden_dim, hidden_dim), jnp.float32, -s, s),
        "bo": jax.random.uniform(ks[4], (hidden_dim,), jnp.float32, -s, s),
    }


if __name__ == "__main__":
    # Small shapes: batch=2, seq=8, heads=4, dim_head=16 -> hidden=64
    B, N, heads, dim_head = 2, 8, 4, 16
    H = heads * dim_head

    key = jax.random.PRNGKey(0)
    kx, kp = jax.random.split(key)
    x = jax.random.normal(kx, (B, N, H), jnp.float32)
    params = init_params(kp, H)

    ref = attention_ref(x, params, heads=heads, dim_head=dim_head)

    # Exact-math config (f32 MXU inputs, exact reciprocal): tight check.
    out_f32 = attention_pallas(x, params, heads=heads, dim_head=dim_head,
                               mxu_dtype=jnp.float32,
                               approx_softmax_recip=False)
    out_f32 = jax.block_until_ready(out_f32)
    assert out_f32.shape == (B, N, H)
    assert jnp.allclose(out_f32, ref, atol=1e-4, rtol=1e-4), \
        "f32 kernel mismatch vs reference"

    # Performance config (bf16 MXU inputs, EUP approx reciprocal): loose check.
    out_bf16 = attention_pallas(x, params, heads=heads, dim_head=dim_head,
                                mxu_dtype=jnp.bfloat16,
                                approx_softmax_recip=True)
    out_bf16 = jax.block_until_ready(out_bf16)
    assert out_bf16.shape == (B, N, H)
    assert jnp.allclose(out_bf16, ref, atol=2e-2, rtol=2e-2), \
        "bf16 kernel mismatch vs reference"

    print("KERNEL_OK")
</pallas_src>

<mosaic_0001>
module attributes {stable_mosaic.version = 11 : i64} {
  func.func @_attention_kernel(%arg0: i32, %arg1: memref<1x8x64xf32, #tpu.memory_space<vmem>>, %arg2: memref<1x64xf32, #tpu.memory_space<vmem>>, %arg3: memref<1x64xf32, #tpu.memory_space<vmem>>, %arg4: memref<4x64x384xf32, #tpu.memory_space<vmem>>, %arg5: memref<4x128x64xf32, #tpu.memory_space<vmem>>, %arg6: memref<1x64xf32, #tpu.memory_space<vmem>>, %arg7: memref<1x8x64xf32, #tpu.memory_space<vmem>>, %arg8: memref<8x64xf32, #tpu.memory_space<vmem>>) attributes {dimension_semantics = [#tpu.dimension_semantics<parallel>], iteration_bounds = array<i64: 2>, scalar_prefetch = 0 : i64, scratch_operands = 1 : i64, tpu.core_type = #tpu.core_type<tc>, window_params = [{transform_indices = @transform_0, window_bounds = array<i64: 1, 8, 64>}, {pipeline_mode = #tpu.pipeline_mode<synchronous>, transform_indices = @transform_1, window_bounds = array<i64: 1, 64>}, {pipeline_mode = #tpu.pipeline_mode<synchronous>, transform_indices = @transform_2, window_bounds = array<i64: 1, 64>}, {pipeline_mode = #tpu.pipeline_mode<synchronous>, transform_indices = @transform_3, window_bounds = array<i64: 4, 64, 384>}, {pipeline_mode = #tpu.pipeline_mode<synchronous>, transform_indices = @transform_4, window_bounds = array<i64: 4, 128, 64>}, {pipeline_mode = #tpu.pipeline_mode<synchronous>, transform_indices = @transform_5, window_bounds = array<i64: 1, 64>}, {transform_indices = @transform_6, window_bounds = array<i64: 1, 8, 64>}]} {
    %c0 = arith.constant 0 : index
    %c0_0 = arith.constant 0 : index
    %c0_1 = arith.constant 0 : index
    %0 = vector.load %arg1[%c0, %c0_0, %c0_1] : memref<1x8x64xf32, #tpu.memory_space<vmem>>, vector<1x8x64xf32>
    %1 = vector.shape_cast %0 : vector<1x8x64xf32> to vector<8x64xf32>
    %cst = arith.constant dense<0.000000e+00> : vector<8xf32>
    %2 = vector.multi_reduction <add>, %1, %cst [1] : vector<8x64xf32> to vector<8xf32>
    %3 = vector.shape_cast %2 : vector<8xf32> to vector<8x1xf32>
    %cst_2 = arith.constant 6.400000e+01 : f32
    %4 = vector.broadcast %cst_2 : f32 to vector<8x1xf32>
    %5 = arith.divf %3, %4 : vector<8x1xf32>
    %6 = vector.broadcast %5 : vector<8x1xf32> to vector<8x64xf32>
    %7 = arith.subf %1, %6 : vector<8x64xf32>
    %8 = arith.mulf %7, %7 : vector<8x64xf32>
    %cst_3 = arith.constant dense<0.000000e+00> : vector<8xf32>
    %9 = vector.multi_reduction <add>, %8, %cst_3 [1] : vector<8x64xf32> to vector<8xf32>
    %10 = vector.shape_cast %9 : vector<8xf32> to vector<8x1xf32>
    %cst_4 = arith.constant 6.400000e+01 : f32
    %11 = vector.broadcast %cst_4 : f32 to vector<8x1xf32>
    %12 = arith.divf %10, %11 : vector<8x1xf32>
    %cst_5 = arith.constant 9.99999974E-6 : f32
    %13 = vector.broadcast %cst_5 : f32 to vector<8x1xf32>
    %14 = arith.addf %12, %13 : vector<8x1xf32>
    %15 = math.rsqrt %14 : vector<8x1xf32>
    %16 = vector.broadcast %15 : vector<8x1xf32> to vector<8x64xf32>
    %17 = arith.mulf %7, %16 : vector<8x64xf32>
    %c0_6 = arith.constant 0 : index
    %c0_7 = arith.constant 0 : index
    %18 = vector.load %arg2[%c0_6, %c0_7] : memref<1x64xf32, #tpu.memory_space<vmem>>, vector<1x64xf32>
    %19 = vector.shape_cast %18 : vector<1x64xf32> to vector<64xf32>
    %20 = vector.shape_cast %19 : vector<64xf32> to vector<1x64xf32>
    %21 = vector.broadcast %20 : vector<1x64xf32> to vector<8x64xf32>
    %22 = arith.mulf %17, %21 : vector<8x64xf32>
    %c0_8 = arith.constant 0 : index
    %c0_9 = arith.constant 0 : index
    %23 = vector.load %arg3[%c0_8, %c0_9] : memref<1x64xf32, #tpu.memory_space<vmem>>, vector<1x64xf32>
    %24 = vector.shape_cast %23 : vector<1x64xf32> to vector<64xf32>
    %25 = vector.shape_cast %24 : vector<64xf32> to vector<1x64xf32>
    %26 = vector.broadcast %25 : vector<1x64xf32> to vector<8x64xf32>
    %27 = arith.addf %22, %26 : vector<8x64xf32>
    %cst_10 = arith.constant 0.000000e+00 : f32
    %28 = vector.broadcast %cst_10 : f32 to vector<8x64xf32>
    %c0_11 = arith.constant 0 : index
    %c0_12 = arith.constant 0 : index
    %29 = vector.load %arg8[%c0_11, %c0_12] : memref<8x64xf32, #tpu.memory_space<vmem>>, vector<8x64xf32>
    tpu.vector_store %arg8[%c0_11, %c0_12], %28 {strides = array<i32>} : memref<8x64xf32, #tpu.memory_space<vmem>>, vector<8x64xf32>,
    %c0_i32 = arith.constant 0 : i32
    %c4_i32 = arith.constant 4 : i32
    %30 = arith.addi %c0_i32, %c4_i32 : i32
    %c1_i32 = arith.constant 1 : i32
    scf.for %arg9 = %c0_i32 to %30 step %c1_i32  : i32 {
      %40 = arith.index_cast %arg9 : i32 to index
      %c0_21 = arith.constant 0 : index
      %c0_22 = arith.constant 0 : index
      %41 = vector.load %arg4[%40, %c0_21, %c0_22] : memref<4x64x384xf32, #tpu.memory_space<vmem>>, vector<1x64x384xf32>
      %42 = vector.shape_cast %41 : vector<1x64x384xf32> to vector<64x384xf32>
      %cst_23 = arith.constant dense<0.000000e+00> : vector<8x384xf32>
      %43 = tpu.matmul %27, %42, %cst_23 {dimension_numbers = #tpu.dot_dimension_numbers<[1], [0], [0], [1], [0, 0, 1, 1], [], []>} : vector<8x64xf32>, vector<64x384xf32>, vector<8x384xf32> -> vector<8x384xf32>
      %44 = vector.extract_strided_slice %43 {offsets = [0, 0], sizes = [8, 128], strides = [1, 1]} : vector<8x384xf32> to vector<8x128xf32>
      %45 = vector.extract_strided_slice %43 {offsets = [0, 128], sizes = [8, 128], strides = [1, 1]} : vector<8x384xf32> to vector<8x128xf32>
      %46 = vector.extract_strided_slice %43 {offsets = [0, 256], sizes = [8, 128], strides = [1, 1]} : vector<8x384xf32> to vector<8x128xf32>
      %cst_24 = arith.constant dense<0.000000e+00> : vector<8x8xf32>
      %47 = tpu.matmul %44, %45, %cst_24 {dimension_numbers = #tpu.dot_dimension_numbers<[1], [1], [0], [0], [0, 0, 1, 0], [], []>} : vector<8x128xf32>, vector<8x128xf32>, vector<8x8xf32> -> vector<8x8xf32>
      %cst_25 = arith.constant dense<0xFF800000> : vector<8xf32>
      %48 = vector.multi_reduction <maximumf>, %47, %cst_25 [1] : vector<8x8xf32> to vector<8xf32>
      %49 = vector.shape_cast %48 : vector<8xf32> to vector<8x1xf32>
      %50 = vector.broadcast %49 : vector<8x1xf32> to vector<8x8xf32>
      %51 = arith.subf %47, %50 : vector<8x8xf32>
      %52 = math.exp %51 : vector<8x8xf32>
      %cst_26 = arith.constant dense<0.000000e+00> : vector<8xf32>
      %53 = vector.multi_reduction <add>, %52, %cst_26 [1] : vector<8x8xf32> to vector<8xf32>
      %54 = vector.shape_cast %53 : vector<8xf32> to vector<8x1xf32>
      %cst_27 = arith.constant dense<0.000000e+00> : vector<8x128xf32>
      %55 = tpu.matmul %52, %46, %cst_27 {dimension_numbers = #tpu.dot_dimension_numbers<[1], [0], [0], [1], [0, 0, 1, 1], [], []>} : vector<8x8xf32>, vector<8x128xf32>, vector<8x128xf32> -> vector<8x128xf32>
      %56 = tpu.reciprocal %54 : vector<8x1xf32> -> vector<8x1xf32>
      %57 = vector.broadcast %56 : vector<8x1xf32> to vector<8x128xf32>
      %58 = arith.mulf %55, %57 : vector<8x128xf32>
      %c0_28 = arith.constant 0 : index
      %c0_29 = arith.constant 0 : index
      %59 = vector.load %arg8[%c0_28, %c0_29] : memref<8x64xf32, #tpu.memory_space<vmem>>, vector<8x64xf32>
      %60 = arith.index_cast %arg9 : i32 to index
      %c0_30 = arith.constant 0 : index
      %c0_31 = arith.constant 0 : index
      %61 = vector.load %arg5[%60, %c0_30, %c0_31] : memref<4x128x64xf32, #tpu.memory_space<vmem>>, vector<1x128x64xf32>
      %62 = vector.shape_cast %61 : vector<1x128x64xf32> to vector<128x64xf32>
      %cst_32 = arith.constant dense<0.000000e+00> : vector<8x64xf32>
      %63 = tpu.matmul %58, %62, %cst_32 {dimension_numbers = #tpu.dot_dimension_numbers<[1], [0], [0], [1], [0, 0, 1, 1], [], []>} : vector<8x128xf32>, vector<128x64xf32>, vector<8x64xf32> -> vector<8x64xf32>
      %64 = arith.addf %59, %63 : vector<8x64xf32>
      %c0_33 = arith.constant 0 : index
      %c0_34 = arith.constant 0 : index
      %65 = vector.load %arg8[%c0_33, %c0_34] : memref<8x64xf32, #tpu.memory_space<vmem>>, vector<8x64xf32>
      tpu.vector_store %arg8[%c0_33, %c0_34], %64 {strides = array<i32>} : memref<8x64xf32, #tpu.memory_space<vmem>>, vector<8x64xf32>,
    }
    %c4_i32_13 = arith.constant 4 : i32
    %c0_14 = arith.constant 0 : index
    %c0_15 = arith.constant 0 : index
    %31 = vector.load %arg8[%c0_14, %c0_15] : memref<8x64xf32, #tpu.memory_space<vmem>>, vector<8x64xf32>
    %c0_16 = arith.constant 0 : index
    %c0_17 = arith.constant 0 : index
    %32 = vector.load %arg6[%c0_16, %c0_17] : memref<1x64xf32, #tpu.memory_space<vmem>>, vector<1x64xf32>
    %33 = vector.shape_cast %32 : vector<1x64xf32> to vector<64xf32>
    %34 = vector.shape_cast %33 : vector<64xf32> to vector<1x64xf32>
    %35 = vector.broadcast %34 : vector<1x64xf32> to vector<8x64xf32>
    %36 = arith.addf %31, %35 : vector<8x64xf32>
    %c0_18 = arith.constant 0 : index
    %c0_19 = arith.constant 0 : index
    %c0_20 = arith.constant 0 : index
    %37 = vector.load %arg7[%c0_18, %c0_19, %c0_20] : memref<1x8x64xf32, #tpu.memory_space<vmem>>, vector<1x8x64xf32>
    %38 = vector.shape_cast %37 : vector<1x8x64xf32> to vector<8x64xf32>
    %39 = vector.shape_cast %36 : vector<8x64xf32> to vector<1x8x64xf32>
    tpu.vector_store %arg7[%c0_18, %c0_19, %c0_20], %39 {strides = array<i32>} : memref<1x8x64xf32, #tpu.memory_space<vmem>>, vector<1x8x64xf32>,
    return
  }
  func.func @transform_0(%arg0: i32) -> (i32, i32, i32) {
    %c0_i32 = arith.constant 0 : i32
    %c0_i32_0 = arith.constant 0 : i32
    %c0_i32_1 = arith.constant 0 : i32
    return %arg0, %c0_i32, %c0_i32_0 : i32, i32, i32
  }
  func.func @transform_1(%arg0: i32) -> (i32, i32) {
    %c0_i32 = arith.constant 0 : i32
    %c0_i32_0 = arith.constant 0 : i32
    %c0_i32_1 = arith.constant 0 : i32
    return %c0_i32, %c0_i32_0 : i32, i32
  }
  func.func @transform_2(%arg0: i32) -> (i32, i32) {
    %c0_i32 = arith.constant 0 : i32
    %c0_i32_0 = arith.constant 0 : i32
    %c0_i32_1 = arith.constant 0 : i32
    return %c0_i32, %c0_i32_0 : i32, i32
  }
  func.func @transform_3(%arg0: i32) -> (i32, i32, i32) {
    %c0_i32 = arith.constant 0 : i32
    %c0_i32_0 = arith.constant 0 : i32
    %c0_i32_1 = arith.constant 0 : i32
    %c0_i32_2 = arith.constant 0 : i32
    return %c0_i32, %c0_i32_0, %c0_i32_1 : i32, i32, i32
  }
  func.func @transform_4(%arg0: i32) -> (i32, i32, i32) {
    %c0_i32 = arith.constant 0 : i32
    %c0_i32_0 = arith.constant 0 : i32
    %c0_i32_1 = arith.constant 0 : i32
    %c0_i32_2 = arith.constant 0 : i32
    return %c0_i32, %c0_i32_0, %c0_i32_1 : i32, i32, i32
  }
  func.func @transform_5(%arg0: i32) -> (i32, i32) {
    %c0_i32 = arith.constant 0 : i32
    %c0_i32_0 = arith.constant 0 : i32
    %c0_i32_1 = arith.constant 0 : i32
    return %c0_i32, %c0_i32_0 : i32, i32
  }
  func.func @transform_6(%arg0: i32) -> (i32, i32, i32) {
    %c0_i32 = arith.constant 0 : i32
    %c0_i32_0 = arith.constant 0 : i32
    %c0_i32_1 = arith.constant 0 : i32
    return %arg0, %c0_i32, %c0_i32_0 : i32, i32, i32
  }
}

</mosaic_0001>

<bundles_post_ra>
// kernel: tpu_custom_call.1
= control target key start
LH: loop header
LB: loop body
LE: loop exit
PB: predicated region body
PF: predicated region fallthrough
CT: control target
= control target key end

     0   :  { %11 = vsyncpa [#allocation4], 0  ;;  %s1472_s0 = inlined_call_operand.hbm [shape: f32[2,8,64], index: 0, kind: input, shape index: {}]   ;;  %s1473_s1 = inlined_call_operand.vmem [shape: f32[1,64], index: 1, kind: input, shape index: {}]   ;;  %s1474_s2 = inlined_call_operand.vmem [shape: f32[1,64], index: 2, kind: input, shape index: {}]   ;;  %s1475_s3 = inlined_call_operand.vmem [shape: f32[4,64,384], index: 3, kind: input, shape index: {}]   ;;  %s1476_s4 = inlined_call_operand.vmem [shape: f32[4,128,64], index: 4, kind: input, shape index: {}]   ;;  %s1477_s5 = inlined_call_operand.vmem [shape: f32[1,64], index: 5, kind: input, shape index: {}]   ;;  %s1478_s6 = inlined_call_operand.hbm [shape: f32[2,8,64], index: 6, kind: output, shape index: {}]  }
   0x1   :  { %13 = vsyncpa [#allocation4 + $0x1], 0 }
   0x2   :  { %14 = vsyncpa [#allocation5], 0 }
   0x3   :  { %16 = vsyncpa [#allocation5 + $0x1], 0  ;;  %s1204_s21 = smov 0   ;;  %s1206_s22 = smov 0  }
   0x4   :  { %s1208_s23 = smov 0   ;;  %s1210_s24 = smov 0  }
   0x5 LB: > { %s1225_s25 = sadd.s32 4294967295, %s1157_s24   ;;  %s826_s26 = sadd.s32 4294967294, %s1157_s24   ;;  %s1157_s24 = sphi %s1210_s24, %s1493_s24   ;;  %s1153_s23 = sphi %s1208_s23, %s1492_s23   ;;  %s1149_s22 = sphi %s1206_s22, %s1491_s22   ;;  %s1145_s21 = sphi %s1204_s21, %s1490_s21  }
   0x6   : > { %s1229_s27 = sadd.s32 1, %s1157_s24   ;;  %s29_s28 = sadd.s32 1, %s1153_s23 }
   0x7   : > { %s26_s29 = ssub.s32 %s1157_s24, %s1229_s27  ;;  %p36_p0 = scmp.ne.s32.totalorder %s1153_s23, %s1149_s22 }
   0x8   : > { %p27_p1 = scmp.eq.s32.totalorder %s26_s29, 0  ;;  %p37_p2 = scmp.eq.s32.totalorder %s1157_s24, 0 }
   0x9   : > { %p42_p3 = scmp.ne.s32.totalorder %s1149_s22, %s1145_s21  ;;  %p43_p4 = scmp.eq.s32.totalorder %s1225_s25, 0 }
   0xa   : > { %s1241_s30 = scalar_select %p27_p1, %s1153_s23, %s29_s28  }
   0xb   : > { %p1243_p5 = por %p37_p2, %p36_p0  ;;  %p1247_p6 = por %p43_p4, %p42_p3 }
   0xc   : > { %p171_p7 = scmp.eq.s32.totalorder %s1225_s25, 1  ;;  %p177_p8 = scmp.eq.s32.totalorder %s826_s26, 1 }
   0xd   : > { %p1005_p10 = scmp.lt.s32.totalorder %s1157_s24, 2  ;;  %s212_s11 = sand.u32 1, %s1153_s23  }
   0xe   : > { %p1254_p11 = por %p171_p7, %p36_p0  ;;  %p1258_p12 = por %p177_p8, %p42_p3 }
   0xf   : > { %s830_s12 = sshll.u32 %s1157_s24, 7  ;;  %s829_s13 = sshll.u32 %s212_s11, 3 }
  0x10   : > { %s1482_s9 = scalar_select %p1254_p11, 1, 0 }
  0x11   : > { %s1483_s10 = scalar_select %p1258_p12, 1, 0 }
  0x12   : > { %s1267_s16 = scalar_lea.hbm %s1472_s0, %s830_s12  ;;  %s216_s17 = scalar_lea.vmem [#allocation3], %s829_s13 }
  0x13   : > { %s223_s18 = sshll.u32 %s216_s17, 4  ;;  %p1271_p13 = pnand %p1005_p10, %p1243_p5  ;;  %s1275_s18 = int_to_ptr.vmem [resolvable:$true] %s223_s18 }
  0x14   : > { %s213_s20 = scalar_lea.sflag [#allocation4], %s212_s11  ;;  %s1057_s26 = scalar_lea.hbm %s1267_s16, 128 }
  0x15   : > { %p1058_p2 = scmp.ne.s32.totalorder %s1267_s16, %s1057_s26  ;;  %p1059_p3 = pneg %p1271_p13 }
  0x16   : > { %s1062_s7 = scalar_lea.hbm %s1472_s0, 256  ;;  %p1063_p5 = scmp.lt.u32.totalorder %s1267_s16, %s1472_s0 }
  0x17   : > { %p1060_p4 = pnand %p1059_p3, %p1058_p2  ;;  %p1064_p8 = scmp.lt.u32.totalorder %s1062_s7, %s1057_s26 }
  0x18   : > { %p1066_p9 = scmp.lt.u32.totalorder %s1057_s26, %s1267_s16 }
  0x19   : > { %p1061_p7 = pneg %p1060_p4  ;;  %p1065_p10 = por %p1064_p8, %p1063_p5 }
  0x1b   : > { %p1067_p0 = por %p1066_p9, %p1065_p10 }
  0x1d   : > { %p1068_p1 = pnand %p1067_p0, %p1061_p7 }
  0x1f   : > { %1071 = shalt.err (!%p1068_p1)
}
  0x20   : > { %s1072_s11 = scalar_lea.vmem %s1275_s18, 128  ;;  %s1163_s14 = smov [#allocation3]  }
  0x21   : > { %p1073_p2 = scmp.ne.s32.totalorder %s1275_s18, %s1072_s11  ;;  %s1077_s15 = sshll.u32 %s1163_s14, 4  ;;  %s1078_s15 = int_to_ptr.vmem [resolvable:$false] %s1077_s15 }
  0x22   : > { %s1079_s17 = scalar_lea.vmem %s1078_s15, 256  ;;  %p1080_p11 = scmp.lt.s32.totalorder %s1275_s18, %s1078_s15 }
  0x23   : > { %p1075_p4 = pnand %p1073_p2, %p1059_p3  ;;  %p1081_p5 = scmp.lt.s32.totalorder %s1079_s17, %s1072_s11 }
  0x25   : > { %p1076_p12 = pneg %p1075_p4  ;;  %p1082_p8 = por %p1081_p5, %p1080_p11 }
  0x27   : > { %p1083_p9 = pnand %p1082_p8, %p1076_p12 }
  0x29   : > { %1086 = shalt.err (!%p1083_p9)
}
  0x2a   : > { %1000 = dma.hbm_to_vmem [thread:$0]  (!%p1271_p13), %s1267_s16, 128, %s1275_s18, %s213_s20  }
  0x2b   : > { %p1485_p0 = scmp.lt.s32.totalorder %s1157_s24, 3  ;;  %p1486_p1 = scmp.ge.s32.totalorder %s1157_s24, 1 }
  0x2d   : > { %p229_p3 = pnand %p1486_p1, %p1485_p0 }
  0x2e   : > { %s1309_s26 = sand.u32 (!%p229_p3), 1, %s1149_s22  }
  0x2f   : > { %232 = sbr.rel (%p229_p3) target bundleno = 1428 (0x594), region = 44  ;;  %s832_s28 = sshll.u32 (!%p229_p3), %s1309_s26, 3 }
  0x30   : > { %s235_s29 = scalar_lea.sflag (!%p229_p3), [#allocation4], %s1309_s26  ;;  %s238_s7 = scalar_lea.vmem (!%p229_p3), [#allocation3], %s832_s28 }
  0x36   : > { %1136 = dma.done.wait (%p1247_p6), %s235_s29, 128  }
  0x37   : > { %1138 = vsyncadd (%p1247_p6), %s235_s29, 4294967168  ;;  %vm268_vm0 = vcmask 523264   ;;  %v1164_v0 = vmov 0.0   ;;  %v267_v1 = vld [vmem:[%s238_s7] sm:$0xff]  ;;  %v834_v12 = vld [vmem:[%s1473_s1] ss:$0 sm:$0xff] }
  0x38   : > { %299 = vst.msk [vmem:[#allocation2] sm:$0xff] %vm268_vm0, %v1164_v0  ;;  %v269_v2 = vsel %vm268_vm0, %v267_v1, 0.0  ;;  %v835_v14 = vld [vmem:[%s1474_s2] ss:$0 sm:$0xff]  ;;  %s1328_s20 = scalar_lea.vmem [#allocation6], %s832_s28  ;;  %s1330_s12 = smov 0  }
  0x39   : > { %270 = vadd.xlane.f32.xlu0 %v269_v2 }
  0xc6   : > { %v271_v3 = vpop.xlane.xlu0 %270 }
  0xc7   : > { %v273_v4 = vmul.f32 0.015625, %v271_v3 }
  0xc9   : > { %v274_v5 = vsub.f32 %v267_v1, %v273_v4 }
  0xcb   : > { %v275_v6 = vmul.f32 %v274_v5, %v274_v5 }
  0xcd   : > { %v276_v7 = vsel %vm268_vm0, %v275_v6, 0.0 }
  0xce   : > { %277 = vadd.xlane.f32.xlu0 %v276_v7 }
 0x15b   : > { %v278_v8 = vpop.xlane.xlu0 %277 }
 0x15c   : > { %v279_v9 = vmul.f32 0.015625, %v278_v8 }
 0x15e   : > { %v280_v10 = vadd.f32 1e-05, %v279_v9 }
 0x160   : > { %1051 = vrsqrt.f32 %v280_v10 }
 0x16a   : > { %v1052_v11 = vpop.eup %1051 }
 0x16b   : > { %v282_v13 = vmul.f32 %v1052_v11, %v274_v5 }
 0x16d   : > { %v290_v15 = vmul.f32 %v834_v12, %v282_v13 }
 0x16f   : > { %v1326_v16 = vadd.f32 %v835_v14, %v290_v15 }
 0x170 LB: >> { %v1165_v17 = vmov 0.0   ;;  %s846_s13 = smul.u32 192, %s1161_s12  ;;  %vm1166_vm1 = vmmov 0   ;;  %v1167_v45 = vmov 0.0|0.0   ;;  %vm547_vm2 = vcmask 64512   ;;  %s840_s17 = sshll.u32 %s1161_s12, 7  ;;  %s1161_s12 = sphi %s1330_s12, %s305_s12  }
 0x171   : >> { %400 = vmatprep.mubr.f32.mxu1 %v1165_v17  ;;  %896 = vmatprep.subr.mxu0 %v1165_v17  ;;  %s1389_s7 = scalar_lea.vmem %s1476_s4, %s840_s17  ;;  %s305_s12 = sadd.s32 1, %s1161_s12  }
 0x172   : >> { %s1341_s15 = scalar_lea.vmem %s1475_s3, %s846_s13  ;;  %898 = vmatprep.mubr.msk.f32.mxu0 %vm1166_vm1, %v1165_v17  ;;  %v635_v3 = vld [vmem:[%s1389_s7] sm:$0xff]  ;;  %v636_v4 = vld [vmem:[%s1389_s7 + $0x8] sm:$0xff]  ;;  %v637_v5 = vld [vmem:[%s1389_s7 + $0x10] sm:$0xff]  ;;  %p302_p6 = scmp.ge.s32.totalorder %s305_s12, 4  }
 0x173   : >> { %v310_v18 = vld [vmem:[%s1341_s15 + $0x8] sm:$0xff]  ;;  %v313_v19 = vld [vmem:[%s1341_s15 + $0x20] sm:$0xff]  ;;  %v312_v22 = vld [vmem:[%s1341_s15 + $0x18] sm:$0xff]  ;;  %v970_v6 = vpack.c.bf16 %v636_v4, %v635_v3  ;;  %s843_s18 = sshll.u32 (%p302_p6), %s1225_s25, 7  ;;  %s747_s14 = sshll.u32 (%p302_p6), %s1328_s20, 4  ;;  %s1428_s14 = int_to_ptr.vmem [resolvable:$true] %s747_s14 }
 0x174   : >> { %v309_v20 = vld [vmem:[%s1341_s15] sm:$0xff]  ;;  %v941_v21 = vpack.c.bf16 %v313_v19, %v310_v18  ;;  %v316_v23 = vld [vmem:[%s1341_s15 + $0x38] sm:$0xff]  ;;  %v319_v24 = vld [vmem:[%s1341_s15 + $0x50] sm:$0xff]  ;;  %s1425_s11 = scalar_lea.hbm (%p302_p6), %s1478_s6, %s843_s18  ;;  %s734_s12 = scalar_lea.sflag (%p302_p6), [#allocation5], %s1309_s26 }
 0x175   : >> { %v943_v25 = vpack.c.bf16 %v312_v22, %v309_v20  ;;  %v945_v26 = vpack.c.bf16 %v319_v24, %v316_v23  ;;  %v315_v27 = vld [vmem:[%s1341_s15 + $0x30] sm:$0xff]  ;;  %v318_v28 = vld [vmem:[%s1341_s15 + $0x48] sm:$0xff]  ;;  %v325_v30 = vld [vmem:[%s1341_s15 + $0x80] sm:$0xff]  ;;  %p1487_p12 = scmp.ne.s32.totalorder (%p302_p6), %s1482_s9, 0  ;;  %s1168_s25 = smov (%p302_p6), [#allocation6]  }
 0x176   : >> { %v322_v29 = vld [vmem:[%s1341_s15 + $0x68] sm:$0xff]  ;;  %942 = vmatprep.subr.bf16.mxu1 %v941_v21  ;;  %v947_v31 = vpack.c.bf16 %v318_v28, %v315_v27  ;;  %v321_v33 = vld [vmem:[%s1341_s15 + $0x60] sm:$0xff]  ;;  %v324_v34 = vld [vmem:[%s1341_s15 + $0x78] sm:$0xff]  ;;  %s1091_s17 = sshll.u32 (%p302_p6), %s1168_s25, 4  ;;  %s1092_s17 = int_to_ptr.vmem [resolvable:$false] %s1091_s17 }
 0x177   : >> { %944 = vmatpush1.bf16.msra.mxu1 %v943_v25  ;;  %v949_v32 = vpack.c.bf16 %v325_v30, %v322_v29  ;;  %v328_v35 = vld [vmem:[%s1341_s15 + $0x98] sm:$0xff]  ;;  %v331_v36 = vld [vmem:[%s1341_s15 + $0xb0] sm:$0xff]  ;;  %v951_v37 = vpack.c.bf16 %v324_v34, %v321_v33  ;;  %v330_v40 = vld [vmem:[%s1341_s15 + $0xa8] sm:$0xff]  ;;  %s1093_s28 = scalar_lea.vmem (%p302_p6), %s1092_s17, 256  ;;  %p1094_p10 = scmp.lt.s32.totalorder (%p302_p6), %s1428_s14, %s1092_s17 }
 0x178   : >> { %946 = vmatprep.subr.bf16.mxu1 %v945_v26  ;;  %v953_v38 = vpack.c.bf16 %v331_v36, %v328_v35  ;;  %v327_v39 = vld [vmem:[%s1341_s15 + $0x90] sm:$0xff]  ;;  %v314_v43 = vld [vmem:[%s1341_s15 + $0x28] sm:$0xff]  ;;  %v317_v44 = vld [vmem:[%s1341_s15 + $0x40] sm:$0xff] }
 0x179   : >> { %v955_v41 = vpack.c.bf16 %v330_v40, %v327_v39  ;;  %v311_v42 = vld [vmem:[%s1341_s15 + $0x10] sm:$0xff]  ;;  %v320_v47 = vld [vmem:[%s1341_s15 + $0x58] sm:$0xff]  ;;  %v326_v50 = vld [vmem:[%s1341_s15 + $0x88] sm:$0xff] }
 0x17a   : >> { %v958_v46 = vpack.c.bf16 %v314_v43, %v311_v42  ;;  %v961_v48 = vpack.c.bf16 %v320_v47, %v317_v44  ;;  %v323_v49 = vld [vmem:[%s1341_s15 + $0x70] sm:$0xff]  ;;  %v329_v52 = vld [vmem:[%s1341_s15 + $0xa0] sm:$0xff]  ;;  %v332_v53 = vld [vmem:[%s1341_s15 + $0xb8] sm:$0xff]  ;;  %s1087_s15 = scalar_lea.vmem (%p302_p6), %s1428_s14, 128 }
 0x17b   : >> { %948 = vmatpush1.bf16.msra.mxu1 %v947_v31  ;;  %v964_v51 = vpack.c.bf16 %v326_v50, %v323_v49  ;;  %v967_v54 = vpack.c.bf16 %v332_v53, %v329_v52  ;;  %v638_v7 = vld [vmem:[%s1389_s7 + $0x18] sm:$0xff]  ;;  %v639_v9 = vld [vmem:[%s1389_s7 + $0x20] sm:$0xff]  ;;  %v640_v10 = vld [vmem:[%s1389_s7 + $0x28] sm:$0xff]  ;;  %p1088_p11 = scmp.ne.s32.totalorder (%p302_p6), %s1428_s14, %s1087_s15  ;;  %p1095_p2 = scmp.lt.s32.totalorder (%p302_p6), %s1093_s28, %s1087_s15 }
 0x17c   : >> { %950 = vmatprep.subr.bf16.mxu1 %v949_v32  ;;  %v973_v8 = vpack.c.bf16 %v638_v7, %v637_v5  ;;  %v976_v11 = vpack.c.bf16 %v640_v10, %v639_v9  ;;  %v641_v12 = vld [vmem:[%s1389_s7 + $0x30] sm:$0xff]  ;;  %v642_v13 = vld [vmem:[%s1389_s7 + $0x38] sm:$0xff]  ;;  %v643_v15 = vld [vmem:[%s1389_s7 + $0x40] sm:$0xff] }
 0x17d   : >> { %v979_v14 = vpack.c.bf16 %v642_v13, %v641_v12  ;;  %v645_v19 = vld [vmem:[%s1389_s7 + $0x50] sm:$0xff]  ;;  %v646_v20 = vld [vmem:[%s1389_s7 + $0x58] sm:$0xff]  ;;  %v647_v22 = vld [vmem:[%s1389_s7 + $0x60] sm:$0xff]  ;;  %p1089_p13 = pnand (%p302_p6), %p1088_p11, %p1487_p12  ;;  %p1096_p4 = por (%p302_p6), %p1095_p2, %p1094_p10 }
 0x17e   : >> { %v985_v21 = vpack.c.bf16 %v646_v20, %v645_v19  ;;  %v648_v23 = vld [vmem:[%s1389_s7 + $0x68] sm:$0xff]  ;;  %v649_v25 = vld [vmem:[%s1389_s7 + $0x70] sm:$0xff]  ;;  %v650_v26 = vld [vmem:[%s1389_s7 + $0x78] sm:$0xff] }
 0x17f   : >> { %952 = vmatpush1.bf16.msra.mxu1 %v951_v37  ;;  %v988_v24 = vpack.c.bf16 %v648_v23, %v647_v22  ;;  %v991_v27 = vpack.c.bf16 %v650_v26, %v649_v25  ;;  %v632_v33 = vld [vmem:[#allocation2] sm:$0xff]  ;;  %p1090_p7 = pneg (%p302_p6), %p1089_p13 }
 0x180   : >> { %954 = vmatprep.subr.bf16.mxu1 %v953_v38  ;;  %v841_v38 = vld [vmem:[%s1477_s5] ss:$0 sm:$0xff] (%p302_p6) }
 0x181   : > { %p1097_p5 = pnand (%p302_p6), %p1096_p4, %p1090_p7 }
 0x183   : >> { %956 = vmatpush1.bf16.msra.mxu1 %v955_v41 }
 0x184   : >> { %957 = vmatprep.subr.bf16.mxu1 %v1167_v45 }
 0x186   : >> { %837 = vmatmul.mubr.msk.f32.vlgmr.msra.gmra.mrb[0].mxu1 %vm268_vm0, %v1326_v16 }
 0x187   : >> { %893 = vmatprep.mubr.msk.f32.mxu1 %vm1166_vm1, %v1165_v17  ;;  %959 = vmatpush3.bf16.msra.mxu1 %v958_v46 }
 0x188   : >> { %960 = vmatprep.subr.bf16.mxu1 %v1167_v45 }
 0x18b   : >> { %962 = vmatpush3.bf16.msra.mxu1 %v961_v48 }
 0x18c   : >> { %963 = vmatprep.subr.bf16.mxu1 %v1167_v45 }
 0x18f   : >> { %965 = vmatpush3.bf16.msra.mxu1 %v964_v51 }
 0x190   : >> { %966 = vmatprep.subr.bf16.mxu1 %v1167_v45 }
 0x193   : >> { %968 = vmatpush3.bf16.msra.mxu1 %v967_v54 }
 0x194   : >> { %901 = vmatprep.subr.mxu1 %v1165_v17 }
 0x196   : >> { %894 = vmatmul.mubr.msk.f32.vlgmr.msra.gmra.mrb[2].mxu1 %vm268_vm0, %v1326_v16 }
 0x197   : >> { %903 = vmatprep.mubr.msk.f32.mxu1 %vm1166_vm1, %v1165_v17 }
 0x259   : >> { %v402_v55 = vpop.f32.mrb[0].mxu1 }
 0x25a   : >> { %v404_v56 = vpop.f32.mrb[1].mxu1 }
 0x25b   : >> { %897 = vmatpush3.xpose.msra.mxu0 %v404_v56 }
 0x25c   : >> { %969 = vmatprep.subr.bf16.mxu0 %v1167_v45 }
 0x25e   : >> { %899 = vmatmul.mubr.f32.vlgmr.msra.gmra.mrb[0].mxu0 %v402_v55 }
 0x25f   : >> { %938 = vmatprep.mubr.msk.f32.mxu0 %vm1166_vm1, %v1165_v17  ;;  %971 = vmatpush3.bf16.msra.mxu0 %v970_v6  ;;  %v644_v17 = vld [vmem:[%s1389_s7 + $0x48] sm:$0xff] }
 0x260   : >> { %972 = vmatprep.subr.bf16.mxu0 %v1167_v45  ;;  %v982_v18 = vpack.c.bf16 %v644_v17, %v643_v15 }
 0x263   : >> { %974 = vmatpush3.bf16.msra.mxu0 %v973_v8 }
 0x264   : >> { %975 = vmatprep.subr.bf16.mxu0 %v1167_v45 }
 0x267   : >> { %977 = vmatpush3.bf16.msra.mxu0 %v976_v11 }
 0x268   : >> { %978 = vmatprep.subr.bf16.mxu0 %v1167_v45 }
 0x269   : >> { %v473_v60 = vpop.f32.mrb[2].mxu1 }
 0x26a   : >> { %v895_v61 = vpop.f32.mrb[3].mxu1  ;;  %902 = vmatpush3.msra.mxu1 %v473_v60 }
 0x26b   : >> { %980 = vmatpush3.bf16.msra.mxu0 %v979_v14 }
 0x26c   : >> { %981 = vmatprep.subr.bf16.mxu0 %v1167_v45 }
 0x26f   : >> { %983 = vmatpush3.bf16.msra.mxu0 %v982_v18 }
 0x270   : >> { %984 = vmatprep.subr.bf16.mxu0 %v1167_v45 }
 0x273   : >> { %986 = vmatpush3.bf16.msra.mxu0 %v985_v21 }
 0x274   : >> { %987 = vmatprep.subr.bf16.mxu0 %v1167_v45 }
 0x277   : >> { %989 = vmatpush3.bf16.msra.mxu0 %v988_v24 }
 0x278   : >> { %990 = vmatprep.subr.bf16.mxu0 %v1167_v45 }
 0x27b   : >> { %992 = vmatpush3.bf16.msra.mxu0 %v991_v27 }
 0x331   : >> { %v543_v57 = vpop.f32.mrb[0].mxu0 }
 0x332   : >> { %v900_v58 = vpop.f32.mrb[1].mxu0  ;;  %v548_v59 = vsel %vm547_vm2, %v543_v57, -inf }
 0x333   : >> { %549 = vmax.xlane.f32.xlu0 %v548_v59 }
 0x3c0   : >> { %v550_v62 = vpop.xlane.xlu0 %549 }
 0x3c1   : >> { %v551_v63 = vsub.f32 %v543_v57, %v550_v62 }
 0x3c3   : >> { %v552_v0 = vmul.f32 1.442695, %v551_v63 }
 0x3c5   : >> { %1053 = vpow2.f32 %v552_v0 }
 0x3cf   : >> { %v1054_v1 = vpop.eup %1053 }
 0x3d0   : >> { %904 = vmatmul.mubr.msk.f32.vlgmr.msra.gmra.mrb[4].mxu1 %vm547_vm2, %v1054_v1  ;;  %v554_v2 = vsel %vm547_vm2, %v1054_v1, 0.0 }
 0x3d1   : >> { %555 = vadd.xlane.f32.xlu0 %v554_v2 }
 0x45e   : >> { %v556_v28 = vpop.xlane.xlu0 %555 }
 0x45f   : >> { %1055 = vrcp.f32 %v556_v28 }
 0x469   : >> { %v1056_v29 = vpop.eup %1055 }
 0x4a3   : >> { %v626_v30 = vpop.f32.mrb[4].mxu1 }
 0x4a4   : >> { %v631_v31 = vmul.f32 %v1056_v29, %v626_v30  ;;  %v905_v32 = vpop.f32.mrb[5].mxu1 }
 0x4a6   : >> { %939 = vmatmul.mubr.f32.vlgmr.msra.gmra.mrb[2].mxu0 %v631_v31 }
 0x576   : > { %304 = sbr.rel (!%p302_p6) target bundleno = 368 (0x170), region = 98 }
 0x579   : >> { %v717_v34 = vpop.f32.mrb[2].mxu0 }
 0x57a   : >> { %v721_v35 = vadd.f32 %v717_v34, %v632_v33  ;;  %v940_v36 = vpop.f32.mrb[3].mxu0 }
 0x57c   : >> { %722 = vst.msk [vmem:[#allocation2] sm:$0xff] %vm268_vm0, %v721_v35 }
 0x583   : > { %v723_v37 = vld [vmem:[#allocation2] sm:$0xff] }
 0x584   : > { %v731_v39 = vadd.f32 %v841_v38, %v723_v37 }
 0x586   : > { %732 = vst.msk [vmem:[%s1328_s20] sm:$0xff] %vm268_vm0, %v731_v39 }
 0x587   : > { %1100 = shalt.err (!%p1097_p5)
}
 0x588   : > { %s1101_s26 = scalar_lea.hbm %s1425_s11, 128  ;;  %s1105_s7 = scalar_lea.hbm %s1478_s6, 256 }
 0x589   : > { %p1102_p8 = scmp.ne.s32.totalorder %s1425_s11, %s1101_s26  ;;  %p1106_p1 = scmp.lt.u32.totalorder %s1425_s11, %s1478_s6 }
 0x58a   : > { %p1107_p3 = scmp.lt.u32.totalorder %s1105_s7, %s1101_s26  ;;  %p1109_p11 = scmp.lt.u32.totalorder %s1101_s26, %s1425_s11 }
 0x58b   : > { %p1103_p9 = pnand %p1102_p8, %p1487_p12 }
 0x58c   : > { %p1108_p6 = por %p1107_p3, %p1106_p1 }
 0x58d   : > { %p1104_p0 = pneg %p1103_p9 }
 0x58e   : > { %p1110_p13 = por %p1109_p11, %p1108_p6 }
 0x590   : > { %p1111_p7 = pnand %p1110_p13, %p1104_p0 }
 0x592   : > { %1114 = shalt.err (!%p1111_p7)
}
 0x593   : > { %995 = dma.vmem_to_hbm [thread:$0]  (%p1487_p12), %s1428_s14, 128, %s1425_s11, %s734_s12  }
 0x594 PF: > { %s759_s18 = sand.u32 1, %s1145_s21   ;;  %p1488_p10 = scmp.ne.s32.totalorder %s1483_s10, 0 }
 0x595   : > { %p1489_p2 = scmp.ge.s32.totalorder %s1157_s24, 2  ;;  %s760_s19 = scalar_lea.sflag [#allocation5], %s759_s18 }
 0x597   : > { %p1002_p4 = pnand %p1489_p2, %p1488_p10 }
 0x599   : > { %1140 = dma.done.wait (!%p1002_p4), %s760_s19, 128  }
 0x59a   : > { %1142 = vsyncadd (!%p1002_p4), %s760_s19, 4294967168  ;;  %p19_p5 = scmp.ge.s32.totalorder %s1229_s27, 4   ;;  %s1490_s21 = smov %s1149_s22 }
 0x59b   : > { %s1491_s22 = smov %s1153_s23  ;;  %s1492_s23 = smov %s1241_s30 }
 0x59c   : > { %s1493_s24 = smov %s1229_s27  ;;  %21 = sbr.rel (!%p19_p5) target bundleno = 5 (0x5), region = 109 }
 0x5a3   :  { %765 = vsyncpa [#allocation4], 1 }
 0x5a4   :  { %767 = vsyncpa [#allocation4 + $0x1], 1 }
 0x5a5   :  { %768 = vsyncpa [#allocation5], 1 }
 0x5a6   :  { %770 = vsyncpa [#allocation5 + $0x1], 1 }

</bundles_post_ra>
